<compile_context>
chip_gen: v7x
topology: tpu7x:2x2x1
jax: 0.10.0
libtpu: 0.0.40
codegen_flags: <defaults>
</compile_context>

<pallas_src>
import jax
import jax.numpy as jnp
from jax.experimental import pallas as pl
from jax.experimental.pallas import tpu as pltpu

# Tile of the batch along the lane axis.  128 is plenty for the small test;
# for large batches raise to e.g. 2048-8192 (still tiny vs. any VMEM limit).
TILE_N = 128


def _so3_exp_act_kernel(w_ref, p_ref, out_ref):
    """out = Exp(w) @ p via Rodrigues, batch on the lane axis.

    w_ref   : (3, TILE_N) axis-angle components (wx, wy, wz rows)
    p_ref   : (3, TILE_N) target points          (px, py, pz rows)
    out_ref : (3, TILE_N) rotated points
    """
    wx = w_ref[0:1, :]
    wy = w_ref[1:2, :]
    wz = w_ref[2:3, :]
    px = p_ref[0:1, :]
    py = p_ref[1:2, :]
    pz = p_ref[2:3, :]

    theta2 = wx * wx + wy * wy + wz * wz
    theta = jnp.sqrt(theta2)

    # A = sin(t)/t, B = (1-cos(t))/t^2, with Taylor fallback near t = 0.
    small = theta2 < 1e-8
    safe_t = jnp.where(small, jnp.ones_like(theta), theta)
    A = jnp.where(small, 1.0 - theta2 / 6.0, jnp.sin(safe_t) / safe_t)
    B = jnp.where(small, 0.5 - theta2 / 24.0,
                  (1.0 - jnp.cos(safe_t)) / (safe_t * safe_t))

    # c1 = w x p
    c1x = wy * pz - wz * py
    c1y = wz * px - wx * pz
    c1z = wx * py - wy * px
    # c2 = w x (w x p)
    c2x = wy * c1z - wz * c1y
    c2y = wz * c1x - wx * c1z
    c2z = wx * c1y - wy * c1x

    ox = px + A * c1x + B * c2x
    oy = py + A * c1y + B * c2y
    oz = pz + A * c1z + B * c2z

    # One lane-dense store of the whole (3, TILE_N) output slab.
    out_ref[...] = jnp.concatenate([ox, oy, oz], axis=0)


def so3_exp_act(T, target, tile_n=TILE_N):
    """Pallas equivalent of `pp.Exp(pp.so3(T)) @ target`.

    T      : (N, 3) so3 tangent vectors (axis-angle)
    target : (N, 3) points to rotate
    returns (N, 3) rotated points
    """
    N = T.shape[0]
    n_tiles = pl.cdiv(N, tile_n)
    Np = n_tiles * tile_n

    w = T.astype(jnp.float32)
    p = target.astype(jnp.float32)
    pad = Np - N
    if pad:
        w = jnp.pad(w, ((0, pad), (0, 0)))
        p = jnp.pad(p, ((0, pad), (0, 0)))

    # Layout plumbing: batch onto the lane axis.
    wT = w.T  # (3, Np)
    pT = p.T  # (3, Np)

    out = pl.pallas_call(
        _so3_exp_act_kernel,
        out_shape=jax.ShapeDtypeStruct((3, Np), jnp.float32),
        grid=(n_tiles,),
        in_specs=[
            pl.BlockSpec((3, tile_n), lambda i: (0, i)),
            pl.BlockSpec((3, tile_n), lambda i: (0, i)),
        ],
        out_specs=pl.BlockSpec((3, tile_n), lambda i: (0, i)),
        compiler_params=pltpu.CompilerParams(
            dimension_semantics=("parallel",)),
    )(wT, pT)

    return out.T[:N]


# ----------------------------- reference / test ------------------------------

def _ref_exp_act(w, p):
    """Plain-JAX reference: Exp(w) @ p via Rodrigues."""
    theta = jnp.linalg.norm(w, axis=-1, keepdims=True)
    theta = jnp.maximum(theta, 1e-12)
    A = jnp.sin(theta) / theta
    B = (1.0 - jnp.cos(theta)) / (theta * theta)
    c1 = jnp.cross(w, p)
    c2 = jnp.cross(w, c1)
    return p + A * c1 + B * c2


if __name__ == "__main__":
    key = jax.random.PRNGKey(0)
    k1, k2 = jax.random.split(key)

    N = 300  # not a multiple of TILE_N -> exercises padding + multi-tile grid
    T = jax.random.normal(k1, (N, 3), dtype=jnp.float32)        # so3 tangent vectors
    target = jax.random.normal(k2, (N, 3), dtype=jnp.float32)   # points to rotate

    out = so3_exp_act(T, target)
    out = jax.block_until_ready(out)

    ref = _ref_exp_act(T, target)
    assert out.shape == (N, 3)
    max_err = float(jnp.max(jnp.abs(out - ref)))
    assert max_err < 1e-4, f"mismatch vs reference, max err {max_err}"

    print("KERNEL_OK")
</pallas_src>

<mosaic_0001>
module attributes {stable_mosaic.version = 11 : i64} {
  func.func @_so3_exp_act_kernel(%arg0: i32, %arg1: memref<3x128xf32, #tpu.memory_space<vmem>>, %arg2: memref<3x128xf32, #tpu.memory_space<vmem>>, %arg3: memref<3x128xf32, #tpu.memory_space<vmem>>) attributes {dimension_semantics = [#tpu.dimension_semantics<parallel>], iteration_bounds = array<i64: 3>, scalar_prefetch = 0 : i64, scratch_operands = 0 : i64, tpu.core_type = #tpu.core_type<tc>, window_params = [{transform_indices = @transform_0, window_bounds = array<i64: 3, 128>}, {transform_indices = @transform_1, window_bounds = array<i64: 3, 128>}, {transform_indices = @transform_2, window_bounds = array<i64: 3, 128>}]} {
    %c0 = arith.constant 0 : index
    %c0_0 = arith.constant 0 : index
    %0 = vector.load %arg1[%c0, %c0_0] : memref<3x128xf32, #tpu.memory_space<vmem>>, vector<1x128xf32>
    %c1 = arith.constant 1 : index
    %c0_1 = arith.constant 0 : index
    %1 = vector.load %arg1[%c1, %c0_1] : memref<3x128xf32, #tpu.memory_space<vmem>>, vector<1x128xf32>
    %c2 = arith.constant 2 : index
    %c0_2 = arith.constant 0 : index
    %2 = vector.load %arg1[%c2, %c0_2] : memref<3x128xf32, #tpu.memory_space<vmem>>, vector<1x128xf32>
    %c0_3 = arith.constant 0 : index
    %c0_4 = arith.constant 0 : index
    %3 = vector.load %arg2[%c0_3, %c0_4] : memref<3x128xf32, #tpu.memory_space<vmem>>, vector<1x128xf32>
    %c1_5 = arith.constant 1 : index
    %c0_6 = arith.constant 0 : index
    %4 = vector.load %arg2[%c1_5, %c0_6] : memref<3x128xf32, #tpu.memory_space<vmem>>, vector<1x128xf32>
    %c2_7 = arith.constant 2 : index
    %c0_8 = arith.constant 0 : index
    %5 = vector.load %arg2[%c2_7, %c0_8] : memref<3x128xf32, #tpu.memory_space<vmem>>, vector<1x128xf32>
    %6 = arith.mulf %0, %0 : vector<1x128xf32>
    %7 = arith.mulf %1, %1 : vector<1x128xf32>
    %8 = arith.addf %6, %7 : vector<1x128xf32>
    %9 = arith.mulf %2, %2 : vector<1x128xf32>
    %10 = arith.addf %8, %9 : vector<1x128xf32>
    %11 = math.sqrt %10 : vector<1x128xf32>
    %cst = arith.constant 9.99999993E-9 : f32
    %12 = vector.broadcast %cst : f32 to vector<1x128xf32>
    %13 = arith.cmpf olt, %10, %12 : vector<1x128xf32>
    %cst_9 = arith.constant 1.000000e+00 : f32
    %14 = vector.broadcast %cst_9 : f32 to vector<1x128xf32>
    %15 = arith.select %13, %14, %11 : vector<1x128xi1>, vector<1x128xf32>
    %cst_10 = arith.constant 6.000000e+00 : f32
    %16 = vector.broadcast %cst_10 : f32 to vector<1x128xf32>
    %17 = arith.divf %10, %16 : vector<1x128xf32>
    %cst_11 = arith.constant 1.000000e+00 : f32
    %18 = vector.broadcast %cst_11 : f32 to vector<1x128xf32>
    %19 = arith.subf %18, %17 : vector<1x128xf32>
    %20 = math.sin %15 : vector<1x128xf32>
    %21 = arith.divf %20, %15 : vector<1x128xf32>
    %22 = arith.select %13, %19, %21 : vector<1x128xi1>, vector<1x128xf32>
    %cst_12 = arith.constant 2.400000e+01 : f32
    %23 = vector.broadcast %cst_12 : f32 to vector<1x128xf32>
    %24 = arith.divf %10, %23 : vector<1x128xf32>
    %cst_13 = arith.constant 5.000000e-01 : f32
    %25 = vector.broadcast %cst_13 : f32 to vector<1x128xf32>
    %26 = arith.subf %25, %24 : vector<1x128xf32>
    %27 = math.cos %15 : vector<1x128xf32>
    %cst_14 = arith.constant 1.000000e+00 : f32
    %28 = vector.broadcast %cst_14 : f32 to vector<1x128xf32>
    %29 = arith.subf %28, %27 : vector<1x128xf32>
    %30 = arith.mulf %15, %15 : vector<1x128xf32>
    %31 = arith.divf %29, %30 : vector<1x128xf32>
    %32 = arith.select %13, %26, %31 : vector<1x128xi1>, vector<1x128xf32>
    %33 = arith.mulf %1, %5 : vector<1x128xf32>
    %34 = arith.mulf %2, %4 : vector<1x128xf32>
    %35 = arith.subf %33, %34 : vector<1x128xf32>
    %36 = arith.mulf %2, %3 : vector<1x128xf32>
    %37 = arith.mulf %0, %5 : vector<1x128xf32>
    %38 = arith.subf %36, %37 : vector<1x128xf32>
    %39 = arith.mulf %0, %4 : vector<1x128xf32>
    %40 = arith.mulf %1, %3 : vector<1x128xf32>
    %41 = arith.subf %39, %40 : vector<1x128xf32>
    %42 = arith.mulf %1, %41 : vector<1x128xf32>
    %43 = arith.mulf %2, %38 : vector<1x128xf32>
    %44 = arith.subf %42, %43 : vector<1x128xf32>
    %45 = arith.mulf %2, %35 : vector<1x128xf32>
    %46 = arith.mulf %0, %41 : vector<1x128xf32>
    %47 = arith.subf %45, %46 : vector<1x128xf32>
    %48 = arith.mulf %0, %38 : vector<1x128xf32>
    %49 = arith.mulf %1, %35 : vector<1x128xf32>
    %50 = arith.subf %48, %49 : vector<1x128xf32>
    %51 = arith.mulf %22, %35 : vector<1x128xf32>
    %52 = arith.addf %3, %51 : vector<1x128xf32>
    %53 = arith.mulf %32, %44 : vector<1x128xf32>
    %54 = arith.addf %52, %53 : vector<1x128xf32>
    %55 = arith.mulf %22, %38 : vector<1x128xf32>
    %56 = arith.addf %4, %55 : vector<1x128xf32>
    %57 = arith.mulf %32, %47 : vector<1x128xf32>
    %58 = arith.addf %56, %57 : vector<1x128xf32>
    %59 = arith.mulf %22, %41 : vector<1x128xf32>
    %60 = arith.addf %5, %59 : vector<1x128xf32>
    %61 = arith.mulf %32, %50 : vector<1x128xf32>
    %62 = arith.addf %60, %61 : vector<1x128xf32>
    %63 = tpu.concatenate %54, %58, %62 in 0 : vector<1x128xf32>, vector<1x128xf32>, vector<1x128xf32> -> vector<3x128xf32>
    %c0_15 = arith.constant 0 : index
    %c0_16 = arith.constant 0 : index
    %64 = vector.load %arg3[%c0_15, %c0_16] : memref<3x128xf32, #tpu.memory_space<vmem>>, vector<3x128xf32>
    tpu.vector_store %arg3[%c0_15, %c0_16], %63 {strides = array<i32>} : memref<3x128xf32, #tpu.memory_space<vmem>>, vector<3x128xf32>,
    return
  }
  func.func @transform_0(%arg0: i32) -> (i32, i32) {
    %c0_i32 = arith.constant 0 : i32
    %c0_i32_0 = arith.constant 0 : i32
    return %c0_i32, %arg0 : i32, i32
  }
  func.func @transform_1(%arg0: i32) -> (i32, i32) {
    %c0_i32 = arith.constant 0 : i32
    %c0_i32_0 = arith.constant 0 : i32
    return %c0_i32, %arg0 : i32, i32
  }
  func.func @transform_2(%arg0: i32) -> (i32, i32) {
    %c0_i32 = arith.constant 0 : i32
    %c0_i32_0 = arith.constant 0 : i32
    return %c0_i32, %arg0 : i32, i32
  }
}

</mosaic_0001>

<bundles_post_ra>
// kernel: tpu_custom_call.1
= control target key start
LH: loop header
LB: loop body
LE: loop exit
PB: predicated region body
PF: predicated region fallthrough
CT: control target
= control target key end

     0   :  { %7 = vsyncpa [#allocation3], 0  ;;  %s1145_s0 = inlined_call_operand.hbm [shape: f32[3,384], index: 0, kind: input, shape index: {}]   ;;  %s1146_s1 = inlined_call_operand.hbm [shape: f32[3,384], index: 1, kind: input, shape index: {}]   ;;  %s1147_s2 = inlined_call_operand.hbm [shape: f32[3,384], index: 2, kind: output, shape index: {}]  }
   0x1   :  { %9 = vsyncpa [#allocation3 + $0x1], 0 }
   0x2   :  { %10 = vsyncpa [#allocation6], 0 }
   0x3   :  { %12 = vsyncpa [#allocation6 + $0x1], 0 }
   0x4   :  { %13 = vsyncpa [#allocation4], 0 }
   0x5   :  { %15 = vsyncpa [#allocation4 + $0x1], 0  ;;  %s835_s9 = smov 0   ;;  %s837_s10 = smov 0  }
   0x6   :  { %s839_s11 = smov 0   ;;  %s841_s12 = smov 0  }
   0x7 LB: > { %s856_s13 = sadd.s32 4294967295, %s809_s12   ;;  %s585_s14 = sadd.s32 4294967294, %s809_s12   ;;  %s809_s12 = sphi %s841_s12, %s1165_s12   ;;  %s805_s11 = sphi %s839_s11, %s1164_s11   ;;  %s801_s10 = sphi %s837_s10, %s1163_s10   ;;  %s797_s9 = sphi %s835_s9, %s1162_s9  }
   0x8   : > { %s860_s15 = sadd.s32 1, %s809_s12   ;;  %s28_s16 = sadd.s32 1, %s805_s11 }
   0x9   : > { %s25_s17 = ssub.s32 %s809_s12, %s860_s15  ;;  %p35_p0 = scmp.ne.s32.totalorder %s805_s11, %s801_s10 }
   0xa   : > { %p26_p1 = scmp.eq.s32.totalorder %s25_s17, 0  ;;  %p36_p2 = scmp.eq.s32.totalorder %s809_s12, 0 }
   0xb   : > { %p41_p3 = scmp.ne.s32.totalorder %s801_s10, %s797_s9  ;;  %p42_p4 = scmp.eq.s32.totalorder %s856_s13, 0 }
   0xc   : > { %s872_s18 = scalar_select %p26_p1, %s805_s11, %s28_s16  }
   0xd   : > { %p874_p5 = por %p36_p2, %p35_p0  ;;  %p878_p6 = por %p42_p4, %p41_p3 }
   0xe   : > { %p91_p7 = scmp.eq.s32.totalorder %s856_s13, 2  ;;  %p97_p8 = scmp.eq.s32.totalorder %s585_s14, 2 }
   0xf   : > { %s1151_s20 = scalar_select %p878_p6, 1, 0 }
  0x10   : > { %p629_p9 = scmp.lt.s32.totalorder %s809_s12, 3  ;;  %p884_p10 = por %p91_p7, %p35_p0 }
  0x11   : > { %p888_p11 = por %p97_p8, %p41_p3  ;;  %s893_s23 = sand.u32 1, %s805_s11  }
  0x12   : > { %s1152_s21 = scalar_select %p884_p10, 1, 0 }
  0x13   : > { %s1153_s22 = scalar_select %p888_p11, 1, 0 }
  0x14   : > { %s589_s24 = sshll.u32 %s809_s12, 6  ;;  %s588_s25 = sshll.u32 %s893_s23, 2 }
  0x15   : > { %s902_s28 = scalar_lea.hbm %s1145_s0, %s589_s24  ;;  %s121_s29 = scalar_lea.vmem [#allocation2], %s588_s25 }
  0x16   : > { %s128_s30 = sshll.u32 %s121_s29, 4  ;;  %p908_p12 = pnand %p629_p9, %p874_p5  ;;  %s912_s30 = int_to_ptr.vmem [resolvable:$true] %s128_s30 }
  0x17   : > { %s118_s4 = scalar_lea.sflag [#allocation3], %s893_s23  ;;  %s679_s5 = scalar_lea.hbm %s902_s28, 64 }
  0x18   : > { %p680_p1 = scmp.ne.s32.totalorder %s902_s28, %s679_s5  ;;  %p681_p2 = pneg %p908_p12 }
  0x19   : > { %s684_s8 = scalar_lea.hbm %s1145_s0, 192  ;;  %p685_p5 = scmp.lt.u32.totalorder %s902_s28, %s1145_s0 }
  0x1a   : > { %p682_p3 = pnand %p681_p2, %p680_p1  ;;  %p686_p7 = scmp.lt.u32.totalorder %s684_s8, %s679_s5 }
  0x1b   : > { %p688_p9 = scmp.lt.u32.totalorder %s679_s5, %s902_s28 }
  0x1c   : > { %p683_p4 = pneg %p682_p3  ;;  %p687_p8 = por %p686_p7, %p685_p5 }
  0x1e   : > { %p689_p13 = por %p688_p9, %p687_p8 }
  0x20   : > { %p690_p0 = pnand %p689_p13, %p683_p4 }
  0x22   : > { %693 = shalt.err (!%p690_p0)
}
  0x23   : > { %s694_s17 = scalar_lea.vmem %s912_s30, 64  ;;  %s811_s19 = smov [#allocation2]  }
  0x24   : > { %p695_p1 = scmp.ne.s32.totalorder %s912_s30, %s694_s17  ;;  %s699_s26 = sshll.u32 %s811_s19, 4  ;;  %s700_s26 = int_to_ptr.vmem [resolvable:$false] %s699_s26 }
  0x25   : > { %s701_s27 = scalar_lea.vmem %s700_s26, 128  ;;  %p702_p10 = scmp.lt.s32.totalorder %s912_s30, %s700_s26 }
  0x26   : > { %p697_p3 = pnand %p695_p1, %p681_p2  ;;  %p703_p5 = scmp.lt.s32.totalorder %s701_s27, %s694_s17 }
  0x28   : > { %p698_p11 = pneg %p697_p3  ;;  %p704_p7 = por %p703_p5, %p702_p10 }
  0x2a   : > { %p705_p8 = pnand %p704_p7, %p698_p11 }
  0x2c   : > { %708 = shalt.err (!%p705_p8)
}
  0x2d   : > { %621 = dma.hbm_to_vmem [thread:$0]  (!%p908_p12), %s902_s28, 64, %s912_s30, %s118_s4  }
  0x2e   : > { %p1155_p13 = scmp.lt.s32.totalorder %s809_s12, 4  ;;  %p1156_p0 = scmp.ge.s32.totalorder %s809_s12, 1 }
  0x2f   : > { %s955_s7 = scalar_lea.hbm %s1146_s1, %s589_s24  ;;  %s139_s8 = scalar_lea.vmem [#allocation5], %s588_s25 }
  0x30   : > { %p946_p4 = pnand %p1156_p0, %p1155_p13  ;;  %s146_s14 = sshll.u32 %s139_s8, 4  ;;  %s147_s14 = int_to_ptr.vmem [resolvable:$true] %s146_s14 }
  0x31   : > { %s136_s28 = scalar_lea.sflag [#allocation6], %s893_s23  ;;  %s709_s30 = scalar_lea.hbm %s955_s7, 64 }
  0x32   : > { %s1157_s29 = scalar_select %p946_p4, 1, 0 }
  0x33   : > { %p710_p10 = scmp.ne.s32.totalorder %s955_s7, %s709_s30  ;;  %s714_s24 = scalar_lea.hbm %s1146_s1, 192 }
  0x34   : > { %p715_p1 = scmp.lt.u32.totalorder %s955_s7, %s1146_s1  ;;  %p716_p3 = scmp.lt.u32.totalorder %s714_s24, %s709_s30 }
  0x35   : > { %p712_p11 = pnand %p710_p10, %p681_p2  ;;  %p718_p7 = scmp.lt.u32.totalorder %s709_s30, %s955_s7 }
  0x36   : > { %p717_p5 = por %p716_p3, %p715_p1 }
  0x37   : > { %p713_p9 = pneg %p712_p11 }
  0x38   : > { %p719_p8 = por %p718_p7, %p717_p5 }
  0x3a   : > { %p720_p13 = pnand %p719_p8, %p713_p9 }
  0x3c   : > { %723 = shalt.err (!%p720_p13)
}
  0x3d   : > { %s724_s23 = scalar_lea.vmem %s147_s14, 64  ;;  %s812_s25 = smov [#allocation5]  }
  0x3e   : > { %p725_p0 = scmp.ne.s32.totalorder %s147_s14, %s724_s23  ;;  %s729_s26 = sshll.u32 %s812_s25, 4  ;;  %s730_s26 = int_to_ptr.vmem [resolvable:$false] %s729_s26 }
  0x3f   : > { %s731_s27 = scalar_lea.vmem %s730_s26, 128  ;;  %p732_p6 = scmp.lt.s32.totalorder %s147_s14, %s730_s26 }
  0x40   : > { %p727_p10 = pnand %p725_p0, %p681_p2  ;;  %p733_p4 = scmp.lt.s32.totalorder %s731_s27, %s724_s23 }
  0x42   : > { %p728_p11 = pneg %p727_p10  ;;  %p734_p1 = por %p733_p4, %p732_p6 }
  0x44   : > { %p735_p3 = pnand %p734_p1, %p728_p11 }
  0x46   : > { %738 = shalt.err (!%p735_p3)
}
  0x47   : > { %624 = dma.hbm_to_vmem [thread:$0]  (!%p908_p12), %s955_s7, 64, %s147_s14, %s136_s28  }
  0x48   : > { %p1158_p9 = scmp.ne.s32.totalorder %s1157_s29, 0 }
  0x49   : > { %s982_s5 = sand.u32 (!%p1158_p9), 1, %s801_s10   ;;  %p1159_p6 = scmp.ne.s32.totalorder (!%p1158_p9), %s1151_s20, 0 }
  0x4a   : > { %155 = sbr.rel (%p1158_p9) target bundleno = 215 (0xd7), region = 28  ;;  %s985_s6 = sshll.u32 (!%p1158_p9), %s982_s5, 2 }
  0x4b   : > { %s158_s8 = scalar_lea.sflag (!%p1158_p9), [#allocation3], %s982_s5  ;;  %s161_s30 = scalar_lea.vmem (!%p1158_p9), [#allocation2], %s985_s6 }
  0x51   : > { %784 = dma.done.wait (%p1159_p6), %s158_s8, 64  }
  0x52   : > { %786 = vsyncadd (%p1159_p6), %s158_s8, 4294967232  ;;  %s167_s3 = scalar_lea.sflag [#allocation6], %s982_s5  ;;  %s170_s29 = scalar_lea.vmem [#allocation5], %s985_s6 }
  0x53   : > { %788 = dma.done.wait (%p1159_p6), %s167_s3, 64  }
  0x54   : > { %790 = vsyncadd (%p1159_p6), %s167_s3, 4294967232  ;;  %v196_v0 = vld [vmem:[%s161_s30] sm:$0x1]  ;;  %v197_v1 = vld [vmem:[%s161_s30 + $0x1] sm:$0x1]  ;;  %s195_s20 = scalar_lea.vmem [#allocation7], %s985_s6 }
  0x55   : > { %v198_v2 = vld [vmem:[%s161_s30 + $0x2] sm:$0x1]  ;;  %v999_v3 = vld [vmem:[%s170_s29] sm:$0x1]  ;;  %v1001_v4 = vld [vmem:[%s170_s29 + $0x1] sm:$0x1]  ;;  %v202_v6 = vmul.f32 %v196_v0, %v196_v0  ;;  %v203_v7 = vmul.f32 %v197_v1, %v197_v1 }
  0x56   : > { %v1003_v5 = vld [vmem:[%s170_s29 + $0x2] sm:$0x1]  ;;  %v205_v8 = vmul.f32 %v198_v2, %v198_v2  ;;  %v438_v10 = vmul.f32 %v1001_v4, %v198_v2  ;;  %v440_v11 = vmul.f32 %v999_v3, %v198_v2  ;;  %v443_v14 = vmul.f32 %v1001_v4, %v196_v0  ;;  %s492_s7 = sshll.u32 %s195_s20, 4  ;;  %s605_s14 = sshll.u32 %s856_s13, 6  ;;  %s1099_s7 = int_to_ptr.vmem [resolvable:$true] %s492_s7 }
  0x57   : > { %v437_v9 = vmul.f32 %v1003_v5, %v197_v1  ;;  %v441_v12 = vmul.f32 %v1003_v5, %v196_v0  ;;  %v204_v13 = vadd.f32 %v203_v7, %v202_v6  ;;  %v444_v15 = vmul.f32 %v999_v3, %v197_v1  ;;  %s1104_s16 = scalar_lea.hbm %s1147_s2, %s605_s14  ;;  %s479_s24 = scalar_lea.sflag [#allocation4], %s982_s5 }
  0x58   : > { %v813_v46 = vmov 683565275   ;;  %v814_v48 = vmov 2475754826   ;;  %v815_v50 = vmov 2131351028  }
  0x59   : > { %v1011_v16 = vsub.f32 %v437_v9, %v438_v10  ;;  %v1013_v17 = vsub.f32 %v440_v11, %v441_v12  ;;  %v1015_v18 = vadd.f32 %v205_v8, %v204_v13  ;;  %v1017_v19 = vsub.f32 %v443_v14, %v444_v15  ;;  %s739_s17 = scalar_lea.vmem %s1099_s7, 64  ;;  %p1160_p2 = scmp.ne.s32.totalorder %s1152_s21, 0 }
  0x5a   : > { %v816_v52 = vmov 2102212464   ;;  %v817_v54 = vmov 920167782   ;;  %v818_v61 = vmov 1326507024   ;;  %p740_p12 = scmp.ne.s32.totalorder %s1099_s7, %s739_s17 }
  0x5b   : > { %v1020_v20 = vmul.f32 %v1013_v17, %v198_v2  ;;  %v1023_v21 = vmul.f32 %v1011_v16, %v198_v2  ;;  %v1026_v22 = vmul.f32 %v1013_v17, %v196_v0  ;;  %v1029_v23 = vmul.f32 %v1011_v16, %v197_v1  ;;  %s819_s13 = smov [#allocation7]  }
  0x5c   : > { %669 = vrsqrt.f32 %v1015_v18  ;;  %v1033_v24 = vmul.f32 %v1017_v19, %v197_v1  ;;  %v1036_v25 = vmul.f32 %v1017_v19, %v196_v0  ;;  %vm209_vm0 = vcmp.eq.f32.partialorder %v1015_v18, inf  ;;  %p741_p4 = pnand %p740_p12, %p1160_p2  ;;  %s743_s19 = sshll.u32 %s819_s13, 4  ;;  %s744_s19 = int_to_ptr.vmem [resolvable:$false] %s743_s19 }
  0x5d   : > { %v454_v26 = vsub.f32 %v1026_v22, %v1029_v23  ;;  %v212_v30 = vand.u32 2147483648, %v1015_v18  ;;  %vm211_vm1 = vcmp.eq.f32.partialorder %v1015_v18, 0.0  ;;  %vm214_vm2 = vcmp.lt.f32.partialorder %v1015_v18, 1e-08  ;;  %s745_s23 = scalar_lea.vmem %s744_s19, 128  ;;  %p746_p7 = scmp.lt.s32.totalorder %s1099_s7, %s744_s19 }
  0x5e   : > { %v448_v27 = vsub.f32 %v1033_v24, %v1020_v20  ;;  %v451_v28 = vsub.f32 %v1023_v21, %v1036_v25  ;;  %p742_p5 = pneg %p741_p4  ;;  %p747_p8 = scmp.lt.s32.totalorder %s745_s23, %s739_s17 }
  0x60   : > { %p748_p13 = por %p747_p8, %p746_p7 }
  0x62   : > { %p749_p0 = pnand %p748_p13, %p742_p5 }
  0x66   : > { %v670_v29 = vpop.eup %669 }
  0x67   : > { %v208_v31 = vmul.f32 %v670_v29, %v1015_v18 }
  0x69   : > { %v210_v32 = vsel %vm209_vm0, %v1015_v18, %v208_v31 }
  0x6a   : > { %v213_v33 = vsel %vm211_vm1, %v212_v30, %v210_v32 }
  0x6b   : > { %v1052_v34 = vsel %vm214_vm2, 1.0, %v213_v33 }
  0x6c   : > { %v222_v35 = vand.u32 2139095040, %v1052_v34  ;;  %v219_v37 = vand.u32 2147483647, %v1052_v34  ;;  %vm221_vm10 = vcmp.lt.s32.totalorder %v1052_v34, 0 }
  0x6e   : > { %v223_v36 = vshrl.u32 %v222_v35, 23  ;;  %v226_v40 = vand.u32 8388607, %v219_v37  ;;  %vm220_vm11 = vcmp.le.f32.partialorder %v219_v37, 0.7853982 }
  0x70   : > { %v596_v38 = vadd.s32 4294967169, %v223_v36  ;;  %v227_v43 = vor.u32 8388608, %v226_v40 }
  0x72   : > { %v229_v39 = vadd.s32 1, %v596_v38  ;;  %v267_v63 = vshll.u32 %v227_v43, 8 }
  0x74   : > { %vm230_vm3 = vcmp.gt.s32.totalorder %v229_v39, 0 }
  0x75   : > { %v231_v41 = vsel %vm230_vm3, %v229_v39, 0  ;;  %vm311_vm3 = vweird.f32 %v1052_v34 }
  0x76   : > { %v233_v42 = vand.u32 31, %v231_v41  ;;  %v232_v44 = vshrl.u32 %v231_v41, 5 }
  0x78   : > { %v234_v45 = vsub.s32 32, %v233_v42  ;;  %v236_v47 = vshll.u32 %v813_v46, %v233_v42  ;;  %v239_v49 = vshll.u32 %v814_v48, %v233_v42  ;;  %v242_v51 = vshll.u32 %v815_v50, %v233_v42 }
  0x79   : > { %v245_v53 = vshll.u32 %v816_v52, %v233_v42  ;;  %v248_v55 = vshll.u32 %v817_v54, %v233_v42  ;;  %vm251_vm4 = vcmp.lt.s32.totalorder %v232_v44, 1  ;;  %vm254_vm5 = vcmp.lt.s32.totalorder %v232_v44, 4 }
  0x7a   : > { %v235_v56 = vshrl.u32 %v813_v46, %v234_v45  ;;  %v237_v57 = vshrl.u32 %v814_v48, %v234_v45  ;;  %v240_v58 = vshrl.u32 %v815_v50, %v234_v45  ;;  %v243_v59 = vshrl.u32 %v816_v52, %v234_v45 }
  0x7b   : > { %v246_v60 = vshrl.u32 %v817_v54, %v234_v45  ;;  %v249_v62 = vshrl.u32 %v818_v61, %v234_v45  ;;  %vm252_vm6 = vcmp.lt.s32.totalorder %v232_v44, 2  ;;  %vm253_vm7 = vcmp.lt.s32.totalorder %v232_v44, 3 }
  0x7c   : > { %v238_v0 = vor.u32 %v237_v57, %v236_v47  ;;  %v241_v1 = vor.u32 %v240_v58, %v239_v49  ;;  %v244_v2 = vor.u32 %v243_v59, %v242_v51 }
  0x7d   : > { %v247_v6 = vor.u32 %v246_v60, %v245_v53  ;;  %v250_v7 = vor.u32 %v249_v62, %v248_v55 }
  0x7e   : > { %v255_v8 = vsel %vm251_vm4, %v235_v56, %v238_v0  ;;  %v256_v9 = vsel %vm254_vm5, %v244_v2, 2102212464  ;;  %v259_v10 = vsel %vm251_vm4, %v238_v0, %v241_v1  ;;  %v263_v11 = vsel %vm251_vm4, %v241_v1, %v244_v2 }
  0x7f   : > { %v257_v12 = vsel %vm253_vm7, %v241_v1, %v256_v9  ;;  %v260_v13 = vsel %vm254_vm5, %v247_v6, 920167782  ;;  %v264_v14 = vsel %vm254_vm5, %v250_v7, 1326507024  ;;  %vm475_vm4 = vcmask 1041408  }
  0x80   : > { %v261_v15 = vsel %vm253_vm7, %v244_v2, %v260_v13  ;;  %v265_v29 = vsel %vm253_vm7, %v247_v6, %v264_v14  ;;  %v258_v30 = vsel %vm252_vm6, %v255_v8, %v257_v12  ;;  %v217_v14 = vmul.f32 0.16666667, %v1015_v18 }
  0x81   : > { %v262_v31 = vsel %vm252_vm6, %v259_v10, %v261_v15  ;;  %v266_v32 = vsel %vm252_vm6, %v263_v11, %v265_v29  ;;  %v274_v39 = vmul.u32 %v267_v63, %v258_v30  ;;  %v433_v10 = vmul.f32 %v1052_v34, %v1052_v34 }
  0x82   : > { %v1058_v33 = vmul.u32.u64.low %v267_v63, %v266_v32  ;;  %v1059_v35 = vmul.u32.u64.high %v267_v63, %v266_v32, %v1058_v33  ;;  %v1061_v36 = vmul.u32.u64.low %v267_v63, %v262_v31  ;;  %v1062_v38 = vmul.u32.u64.high %v267_v63, %v262_v31, %v1061_v36 }
  0x83   : > { %v327_v31 = vmul.f32 0.041666668, %v1015_v18 }
  0x84   : > { %vm276_vm8 = vc.u32 %v1059_v35, %v1061_v36  ;;  %v277_v40 = vadd.s32 1, %v1062_v38  ;;  %v275_v51 = vadd.s32 %v1061_v36, %v1059_v35 }
  0x86   : > { %v278_v41 = vsel %vm276_vm8, %v277_v40, %v1062_v38  ;;  %v218_v38 = vsub.f32 1.0, %v217_v14 }
  0x87   : > { %v279_v42 = vadd.s32 %v278_v41, %v274_v39 }
  0x89   : > { %v280_v43 = vadd.s32 536870912, %v279_v42 }
  0x8b   : > { %v281_v44 = vshrl.u32 %v280_v43, 30 }
  0x8d   : > { %v282_v45 = vshll.u32 %v281_v44, 30  ;;  %v305_v63 = vsub.s32 4, %v281_v44 }
  0x8f   : > { %v283_v46 = vsub.s32 %v279_v42, %v282_v45  ;;  %v306_v2 = vsel %vm221_vm10, %v305_v63, %v281_v44  ;;  %v328_v45 = vsub.f32 0.5, %v327_v31 }
  0x90   : > { %v308_v8 = vsel %vm220_vm11, 0, %v306_v2 }
  0x91   : > { %v285_v47 = vsub.s32 0, %v283_v46  ;;  %v312_v9 = vadd.s32 3, %v308_v8  ;;  %v422_v12 = vand.u32 3, %v308_v8 }
  0x93   : > { %v597_v48 = vmin.u32 %v285_v47, %v283_v46  ;;  %v313_v11 = vand.u32 3, %v312_v9  ;;  %vm427_vm13 = vcmp.eq.s32.totalorder %v422_v12, 2  ;;  %vm424_vm15 = vcmp.eq.s32.totalorder %v422_v12, 0 }
  0x94   : > { %vm423_vm1 = vcmp.lt.s32.totalorder %v422_v12, 2 }
  0x95   : > { %v287_v49 = vclz %v597_v48  ;;  %vm318_vm12 = vcmp.eq.s32.totalorder %v313_v11, 2  ;;  %vm315_vm14 = vcmp.eq.s32.totalorder %v313_v11, 0  ;;  %vm314_vm0 = vcmp.lt.s32.totalorder %v313_v11, 2 }
  0x97   : > { %v598_v50 = vadd.s32 4294967294, %v287_v49 }
  0x99   : > { %vm599_vm9 = vcmp.lt.s32.totalorder %v598_v50, 0 }
  0x9a   : > { %v290_v52 = vsel %vm599_vm9, 0, %v598_v50 }
  0x9b   : > { %v291_v53 = vsub.s32 32, %v290_v52  ;;  %v292_v54 = vshll.u32 %v283_v46, %v290_v52  ;;  %v295_v55 = vsub.s32 4294967266, %v290_v52 }
  0x9d   : > { %v293_v56 = vshrl.u32 %v275_v51, %v291_v53  ;;  %v296_v57 = vadd.s32 127, %v295_v55 }
  0x9f   : > { %v294_v58 = vor.u32 %v293_v56, %v292_v54  ;;  %v297_v59 = vshll.u32 %v296_v57, 23 }
  0xa1   : > { %v298_v60 = vor.u32 4788187, %v297_v59  ;;  %v301_v61 = vcvt.s32.f32 %v294_v58 }
  0xa3   : > { %v299_v62 = vand.u32 2147483647, %v298_v60 }
  0xa5   : > { %v302_v0 = vmul.f32 %v301_v61, %v299_v62 }
  0xa7   : > { %v303_v1 = vxor.u32 2147483648, %v302_v0 }
  0xa9   : > { %v304_v6 = vsel %vm221_vm10, %v303_v1, %v302_v0 }
  0xaa   : > { %v307_v7 = vsel %vm220_vm11, %v1052_v34, %v304_v6 }
  0xab   : > { %671 = vcosq.f32 %v307_v7 }
  0xac   : > { %673 = vsinq.f32 %v307_v7 }
  0xad   : > { %675 = vrcp.f32 %v1052_v34 }
  0xae   : > { %677 = vrcp.f32 %v433_v10 }
  0xb5   : > { %v672_v13 = vpop.eup %671 }
  0xb6   : > { %v674_v37 = vpop.eup %673  ;;  %v319_v15 = vxor.u32 2147483648, %v672_v13 }
  0xb7   : > { %v316_v29 = vxor.u32 2147483648, %v674_v37  ;;  %v676_v33 = vpop.eup %675 }
  0xb8   : > { %v320_v30 = vsel %vm318_vm12, %v319_v15, %v674_v37  ;;  %v429_v32 = vsel %vm427_vm13, %v319_v15, %v674_v37  ;;  %v678_v41 = vpop.eup %677 }
  0xb9   : > { %v317_v35 = vsel %vm315_vm14, %v672_v13, %v316_v29  ;;  %v426_v36 = vsel %vm424_vm15, %v672_v13, %v316_v29 }
  0xba   : > { %v321_v39 = vsel %vm314_vm0, %v317_v35, %v320_v30  ;;  %v430_v40 = vsel %vm423_vm1, %v426_v36, %v429_v32 }
  0xbb   : > { %v322_v42 = vsel %vm311_vm3, nan, %v321_v39  ;;  %v431_v43 = vsel %vm311_vm3, nan, %v430_v40 }
  0xbc   : > { %v324_v44 = vmul.f32 %v676_v33, %v322_v42  ;;  %v432_v46 = vsub.f32 1.0, %v431_v43 }
  0xbe   : > { %v325_v47 = vsel %vm214_vm2, %v218_v38, %v324_v44  ;;  %v435_v34 = vmul.f32 %v678_v41, %v432_v46 }
  0xbf   : > { %v455_v48 = vmul.f32 %v1011_v16, %v325_v47  ;;  %v459_v49 = vmul.f32 %v1013_v17, %v325_v47  ;;  %v463_v50 = vmul.f32 %v1017_v19, %v325_v47 }
  0xc0   : > { %v436_v51 = vsel %vm214_vm2, %v328_v45, %v435_v34  ;;  %vm473_vm2 = vcmask 1040384  }
  0xc1   : > { %v456_v52 = vadd.f32 %v455_v48, %v999_v3  ;;  %v457_v53 = vmul.f32 %v448_v27, %v436_v51  ;;  %v460_v54 = vadd.f32 %v459_v49, %v1001_v4  ;;  %v461_v16 = vmul.f32 %v451_v28, %v436_v51 }
  0xc2   : > { %v464_v55 = vadd.f32 %v463_v50, %v1003_v5  ;;  %v465_v17 = vmul.f32 %v454_v26, %v436_v51 }
  0xc3   : > { %v458_v18 = vadd.f32 %v457_v53, %v456_v52  ;;  %v462_v19 = vadd.f32 %v461_v16, %v460_v54 }
  0xc4   : > { %v466_v3 = vadd.f32 %v465_v17, %v464_v55 }
  0xc5   : > { %v468_v4 = vrot.slane %v462_v19, 7 }
  0xc6   : > { %v471_v20 = vrot.slane %v466_v3, 6 }
  0xc7   : > { %v474_v21 = vsel %vm473_vm2, %v458_v18, %v468_v4 }
  0xc8   : > { %v476_v5 = vsel %vm475_vm4, %v474_v21, %v471_v20 }
  0xc9   : > { %477 = vst [vmem:[%s195_s20] sm:$0x7] %v476_v5 }
  0xca   : > { %752 = shalt.err (!%p749_p0)
}
  0xcb   : > { %s753_s25 = scalar_lea.hbm %s1104_s16, 64  ;;  %s757_s5 = scalar_lea.hbm %s1147_s2, 192 }
  0xcc   : > { %p754_p10 = scmp.ne.s32.totalorder %s1104_s16, %s753_s25  ;;  %p758_p3 = scmp.lt.u32.totalorder %s1104_s16, %s1147_s2 }
  0xcd   : > { %p759_p9 = scmp.lt.u32.totalorder %s757_s5, %s753_s25  ;;  %p761_p12 = scmp.lt.u32.totalorder %s753_s25, %s1104_s16 }
  0xce   : > { %p755_p11 = pnand %p754_p10, %p1160_p2 }
  0xcf   : > { %p760_p6 = por %p759_p9, %p758_p3 }
  0xd0   : > { %p756_p1 = pneg %p755_p11 }
  0xd1   : > { %p762_p4 = por %p761_p12, %p760_p6 }
  0xd3   : > { %p763_p5 = pnand %p762_p4, %p756_p1 }
  0xd5   : > { %766 = shalt.err (!%p763_p5)
}
  0xd6   : > { %616 = dma.vmem_to_hbm [thread:$0]  (%p1160_p2), %s1099_s7, 64, %s1104_s16, %s479_s24  }
  0xd7 PF: > { %p630_p7 = scmp.ge.s32.totalorder %s809_s12, 2  ;;  %s504_s30 = sand.u32 1, %s797_s9  }
  0xd8   : > { %p1161_p8 = scmp.ne.s32.totalorder %s1153_s22, 0  ;;  %s505_s3 = scalar_lea.sflag [#allocation4], %s504_s30 }
  0xda   : > { %p626_p13 = pnand %p630_p7, %p1161_p8 }
  0xdc   : > { %792 = dma.done.wait (!%p626_p13), %s505_s3, 64  }
  0xdd   : > { %794 = vsyncadd (!%p626_p13), %s505_s3, 4294967232  ;;  %p18_p0 = scmp.ge.s32.totalorder %s860_s15, 5   ;;  %s1162_s9 = smov %s801_s10 }
  0xde   : > { %s1163_s10 = smov %s805_s11  ;;  %s1164_s11 = smov %s872_s18 }
  0xdf   : > { %s1165_s12 = smov %s860_s15  ;;  %20 = sbr.rel (!%p18_p0) target bundleno = 7 (0x7), region = 86 }
  0xe6   :  { %510 = vsyncpa [#allocation3], 1 }
  0xe7   :  { %512 = vsyncpa [#allocation3 + $0x1], 1 }
  0xe8   :  { %513 = vsyncpa [#allocation6], 1 }
  0xe9   :  { %515 = vsyncpa [#allocation6 + $0x1], 1 }
  0xea   :  { %516 = vsyncpa [#allocation4], 1 }
  0xeb   :  { %518 = vsyncpa [#allocation4 + $0x1], 1 }

</bundles_post_ra>
